<compile_context>
chip_gen: v6e
topology: v6e:2x2x1
jax: 0.10.0
libtpu: 0.0.40
codegen_flags: <defaults>
</compile_context>

<pallas_src>
import functools

import jax
import jax.numpy as jnp
from jax.experimental import pallas as pl
from jax.experimental.pallas import tpu as pltpu

_LANE = 128  # lane width used for every slab (ob_dim, hid, n_actions+1 <= 128)


# ---------------------------------------------------------------------------
# Pallas kernel: RMS update + normalization + MLP backbone + fused heads
# ---------------------------------------------------------------------------
def _policy_kernel(obs_ref, stats_ref, w_ref, out_ref, *, n_actions):
    obs = obs_ref[...]                      # (B, 128) f32, lane-dense (zero-padded)
    B, L = obs.shape
    fB = jnp.float32(B)

    # --- RunningMeanStd.update, single pass over obs (read from HBM once) ---
    old_mean = stats_ref[0:1, :]            # (1, 128)
    old_var = stats_ref[1:2, :]             # (1, 128)
    old_count = stats_ref[2:3, :]           # (1, 128), count broadcast across lanes

    inv_b = 1.0 / fB
    s1 = jnp.sum(obs, axis=0, keepdims=True)          # independent XLU reductions
    s2 = jnp.sum(obs * obs, axis=0, keepdims=True)
    batch_mean = s1 * inv_b
    # biased var (torch unbiased=False); clamp guards E[x^2]-mean^2 cancellation
    batch_var = jnp.maximum(s2 * inv_b - batch_mean * batch_mean, 0.0)

    delta = batch_mean - old_mean
    tot = old_count + fB
    inv_tot = 1.0 / tot                                # one tiny vreg divide
    new_mean = old_mean + delta * (fB * inv_tot)
    m2 = (old_var * old_count + batch_var * fB
          + delta * delta * (old_count * fB * inv_tot))
    new_var = m2 * inv_tot

    # --- normalize with post-update stats (update-then-normalize, as in torch) ---
    inv_std = jax.lax.rsqrt(new_var + 1e-8)            # EUP rsqrt, no VPU divide
    x = jnp.clip((obs - new_mean) * inv_std, -5.0, 5.0)  # padded lanes stay 0

    # --- weights/bias slab: static row views (free) ---
    w1 = w_ref[0:L, :]
    w2 = w_ref[L:2 * L, :]
    wh = w_ref[2 * L:3 * L, :]
    b1 = w_ref[3 * L:3 * L + 1, :]
    b2 = w_ref[3 * L + 1:3 * L + 2, :]
    bh = w_ref[3 * L + 2:3 * L + 3, :]

    # --- MLP backbone: 2 hidden layers, hid zero-padded to 128 -> full vregs ---
    h = jnp.tanh(jnp.dot(x, w1, preferred_element_type=jnp.float32) + b1)
    h = jnp.tanh(jnp.dot(h, w2, preferred_element_type=jnp.float32) + b2)

    # --- fused head: cols [0, A) = logits, col A = value, rest = zero padding ---
    head = jnp.dot(h, wh, preferred_element_type=jnp.float32) + bh     # (B, 128)
    col = jax.lax.broadcasted_iota(jnp.int32, head.shape, 1)
    a_pad = head.shape[-1]

    value = jnp.sum(jnp.where(col == n_actions, head, 0.0),
                    axis=-1, keepdims=True)                            # (B, 1)
    logits = jnp.where(col < n_actions, head, -jnp.inf)                # (B, 128)

    # --- Categorical(logits), deterministic action = argmax (first max) ---
    m = jnp.max(logits, axis=-1, keepdims=True)
    lse = jnp.log(jnp.sum(jnp.exp(logits - m), axis=-1, keepdims=True))
    logp = -lse                           # log_prob of argmax action (z(argmax)=0)
    action = jnp.min(jnp.where(logits == m, col, a_pad),
                     axis=-1, keepdims=True)                           # (B, 1) i32

    per_row = jnp.where(col == 0, action.astype(jnp.float32),
              jnp.where(col == 1, logp,
              jnp.where(col == 2, value, 0.0)))                        # (B, 128)

    # --- single lane-dense output slab: rows [0,B) outputs, B mean, B+1 var ---
    out_rows = out_ref.shape[0]
    parts = [per_row, new_mean, new_var]
    if out_rows > B + 2:
        parts.append(jnp.zeros((out_rows - B - 2, L), jnp.float32))
    out_ref[...] = jnp.concatenate(parts, axis=0)


# ---------------------------------------------------------------------------
# Wrapper
# ---------------------------------------------------------------------------
@functools.partial(jax.jit, static_argnames=("n_actions",))
def mlp_policy_forward(obs, w_slab, rms_mean, rms_var, rms_count, *, n_actions):
    """MlpPolicy.forward(obs, stochastic=False) for a Discrete action space.

    Returns (action, log_prob, value, new_mean, new_var, new_count)."""
    B, D = obs.shape
    L = _LANE
    R = ((B + 2 + 7) // 8) * 8

    # Input slab 1: obs zero-padded to 128 lanes (zero cols -> x=0 -> no effect).
    obs_p = jnp.zeros((B, L), jnp.float32).at[:, :D].set(obs.astype(jnp.float32))

    # Input slab 2: mean / var / count packed into one lane-dense (8, 128) array.
    stats = jnp.zeros((8, L), jnp.float32)
    stats = stats.at[0, :D].set(rms_mean.astype(jnp.float32))
    stats = stats.at[1, :D].set(rms_var.astype(jnp.float32))
    stats = stats.at[2, :].set(rms_count.astype(jnp.float32))

    flops = 2 * B * L * L * 3
    transcendentals = B * 3 * L + L
    bytes_accessed = 4 * (B * L + 8 * L + w_slab.shape[0] * L + R * L)

    # Single block, no grid (whole problem fits one VMEM tile at these shapes).
    # For large rollout batches, tile the batch axis with a "parallel" grid
    # (>=512-row blocks on v5e/v6e, re-budgeted vs v7x's 64 MiB VMEM), keep the
    # weights slab on a constant index_map so it stays VMEM-resident, and on v5e
    # stream obs as bf16; the batch-wide RMS reduction would then need a
    # cross-block accumulator.  Unnecessary at B=8.
    vmem = pl.BlockSpec(memory_space=pltpu.MemorySpace.VMEM)
    out = pl.pallas_call(
        functools.partial(_policy_kernel, n_actions=n_actions),
        in_specs=[vmem, vmem, vmem],
        out_specs=vmem,
        out_shape=jax.ShapeDtypeStruct((R, L), jnp.float32),
        cost_estimate=pl.CostEstimate(flops=flops,
                                      transcendentals=transcendentals,
                                      bytes_accessed=bytes_accessed),
    )(obs_p, stats, w_slab)

    # Unpack: one slice for the per-row triple, one for the new stats rows.
    trip = out[:B, :3]
    action = trip[:, 0].astype(jnp.int32)   # small ints are exact in f32
    log_prob = trip[:, 1]
    value = trip[:, 2]
    stats_rows = out[B:B + 2, :D]
    new_mean = stats_rows[0].astype(rms_mean.dtype)
    new_var = stats_rows[1].astype(rms_var.dtype)
    new_count = rms_count + jnp.asarray(B, rms_count.dtype)
    return action, log_prob, value, new_mean, new_var, new_count


# ---------------------------------------------------------------------------
# Deterministic parameter init (orthogonal like init_(), zero biases) and
# packing of all weights/biases into one lane-dense (392, 128) slab.
# ---------------------------------------------------------------------------
def init_params(key, ob_dim, hid, n_actions):
    def orth(k, out_dim, in_dim, gain):
        w = jax.nn.initializers.orthogonal(scale=gain)(
            k, (out_dim, in_dim), jnp.float32)
        return w.T                                       # stored (in, out)

    k1, k2, k3, k4 = jax.random.split(key, 4)
    return {
        "w1": orth(k1, hid, ob_dim, 1.0),                # (D, hid)
        "b1": jnp.zeros((hid,), jnp.float32),
        "w2": orth(k2, hid, hid, 1.0),                   # (hid, hid)
        "b2": jnp.zeros((hid,), jnp.float32),
        "w_value": orth(k3, 1, hid, 1.0),                # (hid, 1)
        "b_value": jnp.zeros((1,), jnp.float32),
        "w_logits": orth(k4, n_actions, hid, 0.01),      # (hid, A)
        "b_logits": jnp.zeros((n_actions,), jnp.float32),
    }


def pack_params(params, ob_dim, hid, n_actions):
    L = _LANE
    assert ob_dim <= L and hid <= L and n_actions + 1 <= L, \
        "this packed-slab kernel assumes ob_dim, hid, n_actions+1 <= 128"
    rows = ((3 * L + 3 + 7) // 8) * 8                    # 392
    slab = jnp.zeros((rows, L), jnp.float32)
    slab = slab.at[:ob_dim, :hid].set(params["w1"])
    slab = slab.at[L:L + hid, :hid].set(params["w2"])
    slab = slab.at[2 * L:2 * L + hid, :n_actions].set(params["w_logits"])
    slab = slab.at[2 * L:2 * L + hid, n_actions].set(params["w_value"][:, 0])
    slab = slab.at[3 * L, :hid].set(params["b1"])
    slab = slab.at[3 * L + 1, :hid].set(params["b2"])
    slab = slab.at[3 * L + 2, :n_actions].set(params["b_logits"])
    slab = slab.at[3 * L + 2, n_actions].set(params["b_value"][0])
    return slab


# TODO(synk): stochastic=True path (Categorical sampling) would need in-kernel
# Gumbel-max via pltpu.prng_seed/prng_random_bits; only the deterministic
# (argmax) path is implemented.  The continuous (Box) action branch and
# evaluate_actions are likewise not implemented here.

if __name__ == "__main__":
    key = jax.random.PRNGKey(0)
    k_obs, k_par = jax.random.split(key)

    B, D, HID, N_ACT = 8, 16, 64, 6    # ob_space=Box(16,), ac_space=Discrete(6)

    obs = jax.random.normal(k_obs, (B, D), dtype=jnp.float32)
    params = init_params(k_par, D, HID, N_ACT)
    w_slab = pack_params(params, D, HID, N_ACT)

    rms_mean = jnp.zeros((D,), jnp.float32)
    rms_var = jnp.ones((D,), jnp.float32)
    rms_count = jnp.asarray(1e-4, jnp.float32)

    action, log_prob, value, new_mean, new_var, new_count = jax.block_until_ready(
        mlp_policy_forward(obs, w_slab, rms_mean, rms_var, rms_count,
                           n_actions=N_ACT))

    # --- pure-JAX reference (high-precision matmuls) ---
    hp = jax.lax.Precision.HIGHEST
    bm = obs.mean(axis=0)
    bv = obs.var(axis=0)
    bc = jnp.float32(B)
    delta = bm - rms_mean
    tot = rms_count + bc
    ref_mean = rms_mean + delta * bc / tot
    ref_var = (rms_var * rms_count + bv * bc
               + delta * delta * rms_count * bc / tot) / tot
    x = jnp.clip((obs - ref_mean) / jnp.sqrt(ref_var + 1e-8), -5.0, 5.0)
    h = jnp.tanh(jnp.dot(x, params["w1"], precision=hp) + params["b1"])
    h = jnp.tanh(jnp.dot(h, params["w2"], precision=hp) + params["b2"])
    ref_logits = jnp.dot(h, params["w_logits"], precision=hp) + params["b_logits"]
    ref_value = (jnp.dot(h, params["w_value"], precision=hp)
                 + params["b_value"])[:, 0]
    ref_logp_all = jax.nn.log_softmax(ref_logits, axis=-1)
    ref_action = jnp.argmax(ref_logits, axis=-1)

    assert action.shape == (B,) and log_prob.shape == (B,) and value.shape == (B,)
    assert action.dtype == jnp.int32
    assert bool(jnp.all((action >= 0) & (action < N_ACT)))
    # kernel action must hit the (near-)max reference logit (robust to fp ties)
    assert bool(jnp.all(ref_logits[jnp.arange(B), action]
                        >= ref_logits.max(axis=-1) - 1e-3))
    assert bool(jnp.allclose(value, ref_value, atol=2e-3, rtol=2e-3))
    assert bool(jnp.allclose(log_prob, ref_logp_all[jnp.arange(B), ref_action],
                             atol=2e-3, rtol=2e-3))
    assert bool(jnp.allclose(new_mean, ref_mean, atol=1e-4, rtol=1e-4))
    assert bool(jnp.allclose(new_var, ref_var, atol=1e-4, rtol=1e-4))
    assert abs(float(new_count) - (float(rms_count) + B)) < 1e-4
    assert bool(jnp.all(jnp.isfinite(log_prob))) and bool(jnp.all(jnp.isfinite(value)))
    print("KERNEL_OK")
</pallas_src>

<mosaic_0001>
module attributes {stable_mosaic.version = 11 : i64} {
  func.func @_policy_kernel(%arg0: memref<8x128xf32, #tpu.memory_space<vmem>>, %arg1: memref<8x128xf32, #tpu.memory_space<vmem>>, %arg2: memref<392x128xf32, #tpu.memory_space<vmem>>, %arg3: memref<16x128xf32, #tpu.memory_space<vmem>>) attributes {dimension_semantics = [], scalar_prefetch = 0 : i64, scratch_operands = 0 : i64, tpu.core_type = #tpu.core_type<tc>} {
    %c0 = arith.constant 0 : index
    %c0_0 = arith.constant 0 : index
    %0 = vector.load %arg0[%c0, %c0_0] : memref<8x128xf32, #tpu.memory_space<vmem>>, vector<8x128xf32>
    %c0_1 = arith.constant 0 : index
    %c0_2 = arith.constant 0 : index
    %1 = vector.load %arg1[%c0_1, %c0_2] : memref<8x128xf32, #tpu.memory_space<vmem>>, vector<1x128xf32>
    %c1 = arith.constant 1 : index
    %c0_3 = arith.constant 0 : index
    %2 = vector.load %arg1[%c1, %c0_3] : memref<8x128xf32, #tpu.memory_space<vmem>>, vector<1x128xf32>
    %c2 = arith.constant 2 : index
    %c0_4 = arith.constant 0 : index
    %3 = vector.load %arg1[%c2, %c0_4] : memref<8x128xf32, #tpu.memory_space<vmem>>, vector<1x128xf32>
    %cst = arith.constant 1.000000e+00 : f32
    %cst_5 = arith.constant 8.000000e+00 : f32
    %4 = arith.divf %cst, %cst_5 : f32
    %cst_6 = arith.constant dense<0.000000e+00> : vector<128xf32>
    %5 = vector.multi_reduction <add>, %0, %cst_6 [0] : vector<8x128xf32> to vector<128xf32>
    %6 = vector.shape_cast %5 : vector<128xf32> to vector<1x128xf32>
    %7 = arith.mulf %0, %0 : vector<8x128xf32>
    %cst_7 = arith.constant dense<0.000000e+00> : vector<128xf32>
    %8 = vector.multi_reduction <add>, %7, %cst_7 [0] : vector<8x128xf32> to vector<128xf32>
    %9 = vector.shape_cast %8 : vector<128xf32> to vector<1x128xf32>
    %10 = vector.broadcast %4 : f32 to vector<1x128xf32>
    %11 = arith.mulf %6, %10 : vector<1x128xf32>
    %12 = vector.broadcast %4 : f32 to vector<1x128xf32>
    %13 = arith.mulf %9, %12 : vector<1x128xf32>
    %14 = arith.mulf %11, %11 : vector<1x128xf32>
    %15 = arith.subf %13, %14 : vector<1x128xf32>
    %cst_8 = arith.constant 0.000000e+00 : f32
    %16 = vector.broadcast %cst_8 : f32 to vector<1x128xf32>
    %17 = arith.maximumf %15, %16 : vector<1x128xf32>
    %18 = arith.subf %11, %1 : vector<1x128xf32>
    %cst_9 = arith.constant 8.000000e+00 : f32
    %19 = vector.broadcast %cst_9 : f32 to vector<1x128xf32>
    %20 = arith.addf %3, %19 : vector<1x128xf32>
    %cst_10 = arith.constant 1.000000e+00 : f32
    %21 = vector.broadcast %cst_10 : f32 to vector<1x128xf32>
    %22 = arith.divf %21, %20 : vector<1x128xf32>
    %cst_11 = arith.constant 8.000000e+00 : f32
    %23 = vector.broadcast %cst_11 : f32 to vector<1x128xf32>
    %24 = arith.mulf %23, %22 : vector<1x128xf32>
    %25 = arith.mulf %18, %24 : vector<1x128xf32>
    %26 = arith.addf %1, %25 : vector<1x128xf32>
    %27 = arith.mulf %2, %3 : vector<1x128xf32>
    %cst_12 = arith.constant 8.000000e+00 : f32
    %28 = vector.broadcast %cst_12 : f32 to vector<1x128xf32>
    %29 = arith.mulf %17, %28 : vector<1x128xf32>
    %30 = arith.addf %27, %29 : vector<1x128xf32>
    %31 = arith.mulf %18, %18 : vector<1x128xf32>
    %cst_13 = arith.constant 8.000000e+00 : f32
    %32 = vector.broadcast %cst_13 : f32 to vector<1x128xf32>
    %33 = arith.mulf %3, %32 : vector<1x128xf32>
    %34 = arith.mulf %33, %22 : vector<1x128xf32>
    %35 = arith.mulf %31, %34 : vector<1x128xf32>
    %36 = arith.addf %30, %35 : vector<1x128xf32>
    %37 = arith.mulf %36, %22 : vector<1x128xf32>
    %cst_14 = arith.constant 9.99999993E-9 : f32
    %38 = vector.broadcast %cst_14 : f32 to vector<1x128xf32>
    %39 = arith.addf %37, %38 : vector<1x128xf32>
    %40 = math.rsqrt %39 : vector<1x128xf32>
    %41 = vector.broadcast %26 : vector<1x128xf32> to vector<8x128xf32>
    %42 = arith.subf %0, %41 : vector<8x128xf32>
    %43 = vector.broadcast %40 : vector<1x128xf32> to vector<8x128xf32>
    %44 = arith.mulf %42, %43 : vector<8x128xf32>
    %cst_15 = arith.constant -5.000000e+00 : f32
    %cst_16 = arith.constant 5.000000e+00 : f32
    %45 = vector.broadcast %cst_15 : f32 to vector<8x128xf32>
    %46 = arith.maximumf %45, %44 : vector<8x128xf32>
    %47 = vector.broadcast %cst_16 : f32 to vector<8x128xf32>
    %48 = arith.minimumf %47, %46 : vector<8x128xf32>
    %c0_17 = arith.constant 0 : index
    %c0_18 = arith.constant 0 : index
    %49 = vector.load %arg2[%c0_17, %c0_18] : memref<392x128xf32, #tpu.memory_space<vmem>>, vector<128x128xf32>
    %c128 = arith.constant 128 : index
    %c0_19 = arith.constant 0 : index
    %50 = vector.load %arg2[%c128, %c0_19] : memref<392x128xf32, #tpu.memory_space<vmem>>, vector<128x128xf32>
    %c256 = arith.constant 256 : index
    %c0_20 = arith.constant 0 : index
    %51 = vector.load %arg2[%c256, %c0_20] : memref<392x128xf32, #tpu.memory_space<vmem>>, vector<128x128xf32>
    %c384 = arith.constant 384 : index
    %c0_21 = arith.constant 0 : index
    %52 = vector.load %arg2[%c384, %c0_21] : memref<392x128xf32, #tpu.memory_space<vmem>>, vector<1x128xf32>
    %c385 = arith.constant 385 : index
    %c0_22 = arith.constant 0 : index
    %53 = vector.load %arg2[%c385, %c0_22] : memref<392x128xf32, #tpu.memory_space<vmem>>, vector<1x128xf32>
    %c386 = arith.constant 386 : index
    %c0_23 = arith.constant 0 : index
    %54 = vector.load %arg2[%c386, %c0_23] : memref<392x128xf32, #tpu.memory_space<vmem>>, vector<1x128xf32>
    %cst_24 = arith.constant dense<0.000000e+00> : vector<8x128xf32>
    %55 = tpu.matmul %48, %49, %cst_24 {dimension_numbers = #tpu.dot_dimension_numbers<[1], [0], [0], [1], [0, 0, 1, 1], [], []>} : vector<8x128xf32>, vector<128x128xf32>, vector<8x128xf32> -> vector<8x128xf32>
    %56 = vector.broadcast %52 : vector<1x128xf32> to vector<8x128xf32>
    %57 = arith.addf %55, %56 : vector<8x128xf32>
    %58 = math.tanh %57 : vector<8x128xf32>
    %cst_25 = arith.constant dense<0.000000e+00> : vector<8x128xf32>
    %59 = tpu.matmul %58, %50, %cst_25 {dimension_numbers = #tpu.dot_dimension_numbers<[1], [0], [0], [1], [0, 0, 1, 1], [], []>} : vector<8x128xf32>, vector<128x128xf32>, vector<8x128xf32> -> vector<8x128xf32>
    %60 = vector.broadcast %53 : vector<1x128xf32> to vector<8x128xf32>
    %61 = arith.addf %59, %60 : vector<8x128xf32>
    %62 = math.tanh %61 : vector<8x128xf32>
    %cst_26 = arith.constant dense<0.000000e+00> : vector<8x128xf32>
    %63 = tpu.matmul %62, %51, %cst_26 {dimension_numbers = #tpu.dot_dimension_numbers<[1], [0], [0], [1], [0, 0, 1, 1], [], []>} : vector<8x128xf32>, vector<128x128xf32>, vector<8x128xf32> -> vector<8x128xf32>
    %64 = vector.broadcast %54 : vector<1x128xf32> to vector<8x128xf32>
    %65 = arith.addf %63, %64 : vector<8x128xf32>
    %66 = tpu.iota {dimensions = array<i32: 1>} : vector<8x128xi32>
    %c6_i32 = arith.constant 6 : i32
    %67 = vector.broadcast %c6_i32 : i32 to vector<8x128xi32>
    %68 = arith.cmpi eq, %66, %67 : vector<8x128xi32>
    %cst_27 = arith.constant 0.000000e+00 : f32
    %69 = vector.broadcast %cst_27 : f32 to vector<8x128xf32>
    %70 = arith.select %68, %65, %69 : vector<8x128xi1>, vector<8x128xf32>
    %cst_28 = arith.constant dense<0.000000e+00> : vector<8xf32>
    %71 = vector.multi_reduction <add>, %70, %cst_28 [1] : vector<8x128xf32> to vector<8xf32>
    %72 = vector.shape_cast %71 : vector<8xf32> to vector<8x1xf32>
    %c6_i32_29 = arith.constant 6 : i32
    %73 = vector.broadcast %c6_i32_29 : i32 to vector<8x128xi32>
    %74 = arith.cmpi slt, %66, %73 : vector<8x128xi32>
    %cst_30 = arith.constant 0xFF800000 : f32
    %75 = vector.broadcast %cst_30 : f32 to vector<8x128xf32>
    %76 = arith.select %74, %65, %75 : vector<8x128xi1>, vector<8x128xf32>
    %cst_31 = arith.constant dense<0xFF800000> : vector<8xf32>
    %77 = vector.multi_reduction <maximumf>, %76, %cst_31 [1] : vector<8x128xf32> to vector<8xf32>
    %78 = vector.shape_cast %77 : vector<8xf32> to vector<8x1xf32>
    %79 = vector.broadcast %78 : vector<8x1xf32> to vector<8x128xf32>
    %80 = arith.subf %76, %79 : vector<8x128xf32>
    %81 = math.exp %80 : vector<8x128xf32>
    %cst_32 = arith.constant dense<0.000000e+00> : vector<8xf32>
    %82 = vector.multi_reduction <add>, %81, %cst_32 [1] : vector<8x128xf32> to vector<8xf32>
    %83 = vector.shape_cast %82 : vector<8xf32> to vector<8x1xf32>
    %84 = math.log %83 : vector<8x1xf32>
    %cst_33 = arith.constant 0.000000e+00 : f32
    %85 = vector.broadcast %cst_33 : f32 to vector<8x1xf32>
    %86 = arith.subf %85, %84 : vector<8x1xf32>
    %87 = vector.broadcast %78 : vector<8x1xf32> to vector<8x128xf32>
    %88 = arith.cmpf oeq, %76, %87 : vector<8x128xf32>
    %c128_i32 = arith.constant 128 : i32
    %89 = vector.broadcast %c128_i32 : i32 to vector<8x128xi32>
    %90 = arith.select %88, %66, %89 : vector<8x128xi1>, vector<8x128xi32>
    %cst_34 = arith.constant dense<2147483647> : vector<8xi32>
    %91 = vector.multi_reduction <minsi>, %90, %cst_34 [1] : vector<8x128xi32> to vector<8xi32>
    %92 = vector.shape_cast %91 : vector<8xi32> to vector<8x1xi32>
    %c0_i32 = arith.constant 0 : i32
    %93 = vector.broadcast %c0_i32 : i32 to vector<8x128xi32>
    %94 = arith.cmpi eq, %66, %93 : vector<8x128xi32>
    %95 = arith.sitofp %92 : vector<8x1xi32> to vector<8x1xf32>
    %c1_i32 = arith.constant 1 : i32
    %96 = vector.broadcast %c1_i32 : i32 to vector<8x128xi32>
    %97 = arith.cmpi eq, %66, %96 : vector<8x128xi32>
    %c2_i32 = arith.constant 2 : i32
    %98 = vector.broadcast %c2_i32 : i32 to vector<8x128xi32>
    %99 = arith.cmpi eq, %66, %98 : vector<8x128xi32>
    %cst_35 = arith.constant 0.000000e+00 : f32
    %100 = vector.shape_cast %72 : vector<8x1xf32> to vector<8x1xf32>
    %101 = vector.broadcast %100 : vector<8x1xf32> to vector<8x128xf32>
    %102 = vector.broadcast %cst_35 : f32 to vector<8x128xf32>
    %103 = arith.select %99, %101, %102 : vector<8x128xi1>, vector<8x128xf32>
    %104 = vector.shape_cast %86 : vector<8x1xf32> to vector<8x1xf32>
    %105 = vector.broadcast %104 : vector<8x1xf32> to vector<8x128xf32>
    %106 = arith.select %97, %105, %103 : vector<8x128xi1>, vector<8x128xf32>
    %107 = vector.shape_cast %95 : vector<8x1xf32> to vector<8x1xf32>
    %108 = vector.broadcast %107 : vector<8x1xf32> to vector<8x128xf32>
    %109 = arith.select %94, %108, %106 : vector<8x128xi1>, vector<8x128xf32>
    %cst_36 = arith.constant 0.000000e+00 : f32
    %110 = vector.broadcast %cst_36 : f32 to vector<6x128xf32>
    %111 = tpu.concatenate %109, %26, %37, %110 in 0 : vector<8x128xf32>, vector<1x128xf32>, vector<1x128xf32>, vector<6x128xf32> -> vector<16x128xf32>
    %c0_37 = arith.constant 0 : index
    %c0_38 = arith.constant 0 : index
    %112 = vector.load %arg3[%c0_37, %c0_38] : memref<16x128xf32, #tpu.memory_space<vmem>>, vector<16x128xf32>
    tpu.vector_store %arg3[%c0_37, %c0_38], %111 {strides = array<i32>} : memref<16x128xf32, #tpu.memory_space<vmem>>, vector<16x128xf32>,
    return
  }
}

</mosaic_0001>

<bundles_post_ra>
// kernel: mlp_policy_forward.1
= control target key start
LH: loop header
LB: loop body
LE: loop exit
PB: predicated region body
PF: predicated region fallthrough
CT: control target
= control target key end

     0   :  { %8 = vsyncpa [#allocation3], 0  ;;  %s609_s12 = smov [#allocation2]   ;;  %s723_s0 = inlined_call_operand.vmem [shape: f32[8,128], index: 0, kind: input, shape index: {}]   ;;  %s724_s1 = inlined_call_operand.vmem [shape: f32[8,128], index: 1, kind: input, shape index: {}]   ;;  %s725_s2 = inlined_call_operand.hbm [shape: f32[392,128], index: 2, kind: input, shape index: {}]   ;;  %s726_s3 = inlined_call_operand.vmem [shape: f32[16,128], index: 3, kind: output, shape index: {}]  }
   0x1   :  { %s18_s13 = sshll.u32 %s609_s12, 4  ;;  %s19_s13 = int_to_ptr.vmem [resolvable:$true] %s18_s13 }
   0x2   :  { %s595_s14 = scalar_lea.vmem %s19_s13, 6272  ;;  %p600_p1 = scmp.lt.s32.totalorder %s19_s13, %s19_s13 }
   0x3   :  { %p596_p0 = scmp.ne.s32.totalorder %s19_s13, %s595_s14  ;;  %p601_p2 = scmp.lt.s32.totalorder %s595_s14, %s595_s14 }
   0x5   :  { %p602_p3 = por %p601_p2, %p600_p1 }
   0x7   :  { %p603_p4 = pnand %p602_p3, %p596_p0 }
   0x9   :  { %606 = shalt.err (!%p603_p4)
}
   0xa   :  { %s610_s15 = smov 128   ;;  %s611_s16 = smov 8  }
   0xb   :  { %24 = dma.hbm_to_vmem [thread:$0]  %s725_s2, 6272, %s19_s13, [#allocation3], %s610_s15, %s610_s15, %s611_s16  }
   0xc   :  { %607 = dma.done.wait [#allocation3], 6272  }
   0xd   :  { %608 = vsyncadd [#allocation3], 4294961024  ;;  %v612_v0 = vmov 0.0   ;;  %vm613_vm0 = vmmov 0   ;;  %v95_v1 = vld [vmem:[#allocation2 + $0x78] sm:$0xff]  ;;  %v94_v2 = vld [vmem:[#allocation2 + $0x70] sm:$0xff]  ;;  %v68_v60 = vlaneseq }
   0xe   :  { %465 = vmatprep.subr.mxu0 %v612_v0  ;;  %497 = vmatprep.mubr.msk.f32.mxu0 %vm613_vm0, %v612_v0  ;;  %v93_v3 = vld [vmem:[#allocation2 + $0x68] sm:$0xff]  ;;  %v92_v4 = vld [vmem:[#allocation2 + $0x60] sm:$0xff]  ;;  %v91_v6 = vld [vmem:[#allocation2 + $0x58] sm:$0xff]  ;;  %vm399_vm1 = vcmask 1040384   ;;  %vm401_vm2 = vcmask 1041408  }
   0xf   :  { %500 = vmatprep.subr.mxu1 %v612_v0  ;;  %532 = vmatprep.mubr.msk.f32.mxu1 %vm613_vm0, %v612_v0  ;;  %v648_v5 = vld [vmem:[%s723_s0] sm:$0xff]  ;;  %v111_v10 = vld [vmem:[#allocation2 + $0xf8] sm:$0xff]  ;;  %v110_v12 = vld [vmem:[#allocation2 + $0xf0] sm:$0xff] }
  0x10   :  { %466 = vmatpush3.msra.mxu0 %v95_v1  ;;  %v654_v7 = vld [vmem:[%s724_s1 + $0x2] sm:$0x1]  ;;  %v32_v8 = vrot.slane %v648_v5, 4  ;;  %v38_v9 = vmul.f32 %v648_v5, %v648_v5  ;;  %501 = vmatpush3.msra.mxu1 %v111_v10  ;;  %v90_v13 = vld [vmem:[#allocation2 + $0x50] sm:$0xff]  ;;  %v109_v16 = vld [vmem:[#allocation2 + $0xe8] sm:$0xff]  ;;  %v69_v1 = vshrl.u32 %v68_v60, 7 }
  0x11   :  { %467 = vmatprep.subr.mxu0 %v612_v0  ;;  %v51_v11 = vadd.f32 8.0, %v654_v7  ;;  %502 = vmatprep.subr.mxu1 %v612_v0  ;;  %v89_v17 = vld [vmem:[#allocation2 + $0x48] sm:$0xff]  ;;  %v108_v20 = vld [vmem:[#allocation2 + $0xe0] sm:$0xff]  ;;  %v107_v24 = vld [vmem:[#allocation2 + $0xd8] sm:$0xff]  ;;  %v61_v37 = vmul.f32 8.0, %v654_v7 }
  0x12   :  { %468 = vmatpush3.msra.mxu0 %v94_v2  ;;  %v33_v14 = vadd.f32 %v32_v8, %v648_v5  ;;  %v39_v15 = vrot.slane %v38_v9, 4  ;;  %503 = vmatpush3.msra.mxu1 %v110_v12  ;;  %v88_v21 = vld [vmem:[#allocation2 + $0x40] sm:$0xff]  ;;  %v87_v25 = vld [vmem:[#allocation2 + $0x38] sm:$0xff]  ;;  %v106_v28 = vld [vmem:[#allocation2 + $0xd0] sm:$0xff] }
  0x13   :  { %469 = vmatprep.subr.mxu0 %v612_v0  ;;  %575 = vrcp.f32 %v51_v11  ;;  %504 = vmatprep.subr.mxu1 %v612_v0  ;;  %v86_v29 = vld [vmem:[#allocation2 + $0x30] sm:$0xff]  ;;  %v105_v32 = vld [vmem:[#allocation2 + $0xc8] sm:$0xff]  ;;  %v29_v33 = vld [vmem:[%s724_s1] sm:$0x1] }
  0x14   :  { %470 = vmatpush3.msra.mxu0 %v93_v3  ;;  %v34_v18 = vrot.slane %v33_v14, 2  ;;  %v40_v19 = vadd.f32 %v39_v15, %v38_v9  ;;  %505 = vmatpush3.msra.mxu1 %v109_v16  ;;  %v85_v34 = vld [vmem:[#allocation2 + $0x28] sm:$0xff]  ;;  %v84_v38 = vld [vmem:[#allocation2 + $0x20] sm:$0xff]  ;;  %v83_v44 = vld [vmem:[#allocation2 + $0x18] sm:$0xff] }
  0x15   :  { %471 = vmatprep.subr.mxu0 %v612_v0  ;;  %506 = vmatprep.subr.mxu1 %v612_v0  ;;  %v30_v42 = vld [vmem:[%s724_s1 + $0x1] sm:$0x1]  ;;  %v82_v48 = vld [vmem:[#allocation2 + $0x10] sm:$0xff]  ;;  %v81_v51 = vld [vmem:[#allocation2 + $0x8] sm:$0xff] }
  0x16   :  { %472 = vmatpush3.msra.mxu0 %v92_v4  ;;  %v35_v22 = vadd.f32 %v34_v18, %v33_v14  ;;  %v41_v23 = vrot.slane %v40_v19, 2  ;;  %507 = vmatpush3.msra.mxu1 %v108_v20  ;;  %v57_v50 = vmul.f32 %v654_v7, %v30_v42  ;;  %v80_v55 = vld [vmem:[#allocation2] sm:$0xff]  ;;  %v70_v4 = vsub.s32 0, %v69_v1  ;;  %v102_v14 = vld [vmem:[#allocation2 + $0xb0] sm:$0xff]  ;;  %v101_v15 = vld [vmem:[#allocation2 + $0xa8] sm:$0xff] }
  0x17   :  { %473 = vmatprep.subr.mxu0 %v612_v0  ;;  %508 = vmatprep.subr.mxu1 %v612_v0  ;;  %v104_v12 = vld [vmem:[#allocation2 + $0xc0] sm:$0xff]  ;;  %v99_v16 = vld [vmem:[#allocation2 + $0x98] sm:$0xff]  ;;  %v97_v18 = vld [vmem:[#allocation2 + $0x88] sm:$0xff] }
  0x18   :  { %474 = vmatpush3.msra.mxu0 %v91_v6  ;;  %v36_v26 = vrot.slane %v35_v22, 1  ;;  %v42_v27 = vadd.f32 %v41_v23, %v40_v19  ;;  %509 = vmatpush3.msra.mxu1 %v107_v24  ;;  %v96_v19 = vld [vmem:[#allocation2 + $0x80] sm:$0xff]  ;;  %v127_v20 = vld [vmem:[#allocation2 + $0x178] sm:$0xff] }
  0x19   :  { %475 = vmatprep.subr.mxu0 %v612_v0  ;;  %510 = vmatprep.subr.mxu1 %v612_v0  ;;  %v124_v23 = vld [vmem:[#allocation2 + $0x160] sm:$0xff]  ;;  %v123_v24 = vld [vmem:[#allocation2 + $0x158] sm:$0xff] }
  0x1a   :  { %476 = vmatpush3.msra.mxu0 %v90_v13  ;;  %v37_v30 = vadd.f32 %v36_v26, %v35_v22  ;;  %v43_v31 = vrot.slane %v42_v27, 1  ;;  %511 = vmatpush3.msra.mxu1 %v106_v28  ;;  %v103_v13 = vld [vmem:[#allocation2 + $0xb8] sm:$0xff]  ;;  %v125_v22 = vld [vmem:[#allocation2 + $0x168] sm:$0xff] }
  0x1b   :  { %477 = vmatprep.subr.mxu0 %v612_v0  ;;  %512 = vmatprep.subr.mxu1 %v612_v0  ;;  %v121_v26 = vld [vmem:[#allocation2 + $0x148] sm:$0xff] }
  0x1c   :  { %478 = vmatpush3.msra.mxu0 %v89_v17  ;;  %v44_v35 = vadd.f32 %v43_v31, %v42_v27  ;;  %v45_v36 = vmul.f32 0.125, %v37_v30  ;;  %513 = vmatpush3.msra.mxu1 %v105_v32  ;;  %v98_v17 = vld [vmem:[#allocation2 + $0x90] sm:$0xff]  ;;  %v411_v27 = vld [vmem:[#allocation2 + $0x180] ss:$0 sm:$0xff] }
  0x1d   :  { %479 = vmatprep.subr.mxu0 %v612_v0  ;;  %514 = vmatprep.subr.mxu1 %v612_v0  ;;  %v120_v32 = vld [vmem:[#allocation2 + $0x140] sm:$0xff] }
  0x1e   :  { %480 = vmatpush3.msra.mxu0 %v88_v21  ;;  %v46_v39 = vmul.f32 0.125, %v44_v35  ;;  %v47_v40 = vmul.f32 %v45_v36, %v45_v36  ;;  %v50_v41 = vsub.f32 %v45_v36, %v29_v33  ;;  %515 = vmatpush3.msra.mxu1 %v104_v12  ;;  %v126_v21 = vld [vmem:[#allocation2 + $0x170] sm:$0xff]  ;;  %v117_v35 = vld [vmem:[#allocation2 + $0x128] sm:$0xff]  ;;  %v116_v36 = vld [vmem:[#allocation2 + $0x120] sm:$0xff] }
  0x1f   :  { %481 = vmatprep.subr.mxu0 %v612_v0  ;;  %516 = vmatprep.subr.mxu1 %v612_v0 }
  0x20   :  { %482 = vmatpush3.msra.mxu0 %v87_v25  ;;  %v576_v43 = vpop.eup %575  ;;  %v48_v45 = vsub.f32 %v46_v39, %v47_v40  ;;  %v60_v46 = vmul.f32 %v50_v41, %v50_v41  ;;  %517 = vmatpush3.msra.mxu1 %v103_v13  ;;  %v122_v25 = vld [vmem:[#allocation2 + $0x150] sm:$0xff]  ;;  %v113_v39 = vld [vmem:[#allocation2 + $0x108] sm:$0xff]  ;;  %v112_v40 = vld [vmem:[#allocation2 + $0x100] sm:$0xff] }
  0x21   :  { %483 = vmatprep.subr.mxu0 %v612_v0  ;;  %v62_v47 = vmul.f32 %v576_v43, %v61_v37  ;;  %v54_v52 = vmul.f32 8.0, %v576_v43  ;;  %518 = vmatprep.subr.mxu1 %v612_v0  ;;  %v115_v37 = vld [vmem:[#allocation2 + $0x118] sm:$0xff] }
  0x22   :  { %484 = vmatpush3.msra.mxu0 %v86_v29  ;;  %v49_v49 = vmax.f32 %v48_v45, 0.0  ;;  %519 = vmatpush3.msra.mxu1 %v102_v14 }
  0x23   :  { %485 = vmatprep.subr.mxu0 %v612_v0  ;;  %v63_v54 = vmul.f32 %v62_v47, %v60_v46  ;;  %v55_v57 = vmul.f32 %v54_v52, %v50_v41  ;;  %520 = vmatprep.subr.mxu1 %v612_v0  ;;  %v412_v41 = vld [vmem:[#allocation2 + $0x181] ss:$0 sm:$0xff]  ;;  %v356_v46 = vand.u32 127, %v68_v60  ;;  %v413_v47 = vld [vmem:[#allocation2 + $0x182] ss:$0 sm:$0xff] }
  0x24   :  { %486 = vmatpush3.msra.mxu0 %v85_v34  ;;  %v58_v53 = vmul.f32 8.0, %v49_v49  ;;  %521 = vmatpush3.msra.mxu1 %v101_v15  ;;  %v118_v34 = vld [vmem:[#allocation2 + $0x130] sm:$0xff] }
  0x25   :  { %487 = vmatprep.subr.mxu0 %v612_v0  ;;  %v56_v61 = vadd.f32 %v55_v57, %v29_v33  ;;  %522 = vmatprep.subr.mxu1 %v612_v0  ;;  %v119_v33 = vld [vmem:[#allocation2 + $0x138] sm:$0xff]  ;;  %vm361_vm3 = vcmp.lt.s32.totalorder %v356_v46, 6  ;;  %vm357_vm5 = vcmp.eq.s32.totalorder %v356_v46, 6  ;;  %vm392_vm7 = vcmp.eq.s32.totalorder %v356_v46, 2 }
  0x26   :  { %488 = vmatpush3.msra.mxu0 %v84_v38  ;;  %v59_v56 = vadd.f32 %v58_v53, %v57_v50  ;;  %v114_v38 = vld [vmem:[#allocation2 + $0x110] sm:$0xff]  ;;  %vm391_vm8 = vcmp.eq.s32.totalorder %v356_v46, 1  ;;  %vm389_vm9 = vcmp.eq.s32.totalorder %v356_v46, 0 }
  0x27   :  { %489 = vmatprep.subr.mxu0 %v612_v0  ;;  %v71_v6 = vrot.slane %v56_v61, %v70_v4 }
  0x28   :  { %490 = vmatpush3.msra.mxu0 %v83_v44  ;;  %v64_v58 = vadd.f32 %v63_v54, %v59_v56 }
  0x29   :  { %491 = vmatprep.subr.mxu0 %v612_v0  ;;  %v72_v7 = vsub.f32 %v648_v5, %v71_v6  ;;  %v100_v5 = vld [vmem:[#allocation2 + $0xa0] sm:$0xff] }
  0x2a   :  { %492 = vmatpush3.msra.mxu0 %v82_v48  ;;  %v65_v59 = vmul.f32 %v576_v43, %v64_v58  ;;  %523 = vmatpush3.msra.mxu1 %v100_v5 }
  0x2b   :  { %493 = vmatprep.subr.mxu0 %v612_v0  ;;  %524 = vmatprep.subr.mxu1 %v612_v0 }
  0x2c   :  { %494 = vmatpush3.msra.mxu0 %v81_v51  ;;  %v66_v62 = vadd.f32 1e-08, %v65_v59  ;;  %v397_v63 = vrot.slane %v65_v59, 7  ;;  %525 = vmatpush3.msra.mxu1 %v99_v16 }
  0x2d   :  { %495 = vmatprep.subr.mxu0 %v612_v0  ;;  %526 = vmatprep.subr.mxu1 %v612_v0 }
  0x2e   :  { %496 = vmatpush3.msra.mxu0 %v80_v55  ;;  %577 = vrsqrt.f32 %v66_v62  ;;  %v400_v2 = vsel %vm399_vm1, %v56_v61, %v397_v63  ;;  %527 = vmatpush3.msra.mxu1 %v98_v17 }
  0x2f   :  { %535 = vmatprep.subr.mxu0 %v612_v0  ;;  %v402_v3 = vsel %vm401_vm2, %v400_v2, 0.0  ;;  %528 = vmatprep.subr.mxu1 %v612_v0 }
  0x30   :  { %404 = vst [vmem:[%s726_s3 + $0x8] sm:$0xff] %v402_v3  ;;  %529 = vmatpush3.msra.mxu1 %v97_v18 }
  0x31   :  { %530 = vmatprep.subr.mxu1 %v612_v0 }
  0x32   :  { %531 = vmatpush3.msra.mxu1 %v96_v19 }
  0x3b   :  { %v578_v8 = vpop.eup %577 }
  0x3c   :  { %v76_v9 = vrot.slane %v578_v8, %v70_v4 }
  0x3e   :  { %v77_v10 = vmul.f32 %v76_v9, %v72_v7 }
  0x40   :  { %v410_v11 = vclamps-f32 %v77_v10, 5.0 }
  0x42   :  { %498 = vmatmul.mubr.f32.vlgmr.msra.gmra.mxu0 %v410_v11 }
  0x43   :  { %567 = vmatprep.mubr.msk.f32.mxu0 %vm613_vm0, %v612_v0  ;;  %536 = vmatpush3.msra.mxu0 %v127_v20 }
  0x44   :  { %537 = vmatprep.subr.mxu0 %v612_v0 }
  0x45   :  { %538 = vmatpush3.msra.mxu0 %v126_v21 }
  0x46   :  { %539 = vmatprep.subr.mxu0 %v612_v0 }
  0x47   :  { %540 = vmatpush3.msra.mxu0 %v125_v22 }
  0x48   :  { %541 = vmatprep.subr.mxu0 %v612_v0 }
  0x49   :  { %542 = vmatpush3.msra.mxu0 %v124_v23 }
  0x4a   :  { %543 = vmatprep.subr.mxu0 %v612_v0 }
  0x4b   :  { %544 = vmatpush3.msra.mxu0 %v123_v24 }
  0x4c   :  { %545 = vmatprep.subr.mxu0 %v612_v0 }
  0x4d   :  { %546 = vmatpush3.msra.mxu0 %v122_v25 }
  0x4e   :  { %547 = vmatprep.subr.mxu0 %v612_v0 }
  0x4f   :  { %548 = vmatpush3.msra.mxu0 %v121_v26 }
  0x50   :  { %549 = vmatprep.subr.mxu0 %v612_v0 }
  0x51   :  { %550 = vmatpush3.msra.mxu0 %v120_v32 }
  0x52   :  { %551 = vmatprep.subr.mxu0 %v612_v0 }
  0x53   :  { %552 = vmatpush3.msra.mxu0 %v119_v33 }
  0x54   :  { %553 = vmatprep.subr.mxu0 %v612_v0 }
  0x55   :  { %554 = vmatpush3.msra.mxu0 %v118_v34 }
  0x56   :  { %555 = vmatprep.subr.mxu0 %v612_v0 }
  0x57   :  { %556 = vmatpush3.msra.mxu0 %v117_v35 }
  0x58   :  { %557 = vmatprep.subr.mxu0 %v612_v0 }
  0x59   :  { %558 = vmatpush3.msra.mxu0 %v116_v36 }
  0x5a   :  { %559 = vmatprep.subr.mxu0 %v612_v0 }
  0x5b   :  { %560 = vmatpush3.msra.mxu0 %v115_v37 }
  0x5c   :  { %561 = vmatprep.subr.mxu0 %v612_v0 }
  0x5d   :  { %562 = vmatpush3.msra.mxu0 %v114_v38 }
  0x5e   :  { %563 = vmatprep.subr.mxu0 %v612_v0 }
  0x5f   :  { %564 = vmatpush3.msra.mxu0 %v113_v39 }
  0x60   :  { %565 = vmatprep.subr.mxu0 %v612_v0 }
  0x61   :  { %566 = vmatpush3.msra.mxu0 %v112_v40 }
 0x102   :  { %v201_v28 = vpop.f32.mrf.mxu0 }
 0x103   :  { %v202_v29 = vadd.f32 %v411_v27, %v201_v28 }
 0x104   :  { %v499_v30 = vpop.f32.mrf.mxu0 }
 0x105   :  { %579 = vtanh.f32 %v202_v29 }
 0x112   :  { %v580_v31 = vpop.eup %579 }
 0x113   :  { %533 = vmatmul.mubr.f32.vlgmr.msra.gmra.mxu1 %v580_v31 }
 0x1d3   :  { %v276_v42 = vpop.f32.mrf.mxu1 }
 0x1d4   :  { %v277_v43 = vadd.f32 %v412_v41, %v276_v42 }
 0x1d5   :  { %v534_v44 = vpop.f32.mrf.mxu1 }
 0x1d6   :  { %581 = vtanh.f32 %v277_v43 }
 0x1e3   :  { %v582_v45 = vpop.eup %581 }
 0x1e4   :  { %568 = vmatmul.mubr.f32.vlgmr.msra.gmra.mxu0 %v582_v45 }
 0x2a4   :  { %v351_v48 = vpop.f32.mrf.mxu0 }
 0x2a5   :  { %v352_v49 = vadd.f32 %v413_v47, %v351_v48 }
 0x2a6   :  { %v569_v50 = vpop.f32.mrf.mxu0 }
 0x2a7   :  { %v362_v51 = vsel %vm361_vm3, %v352_v49, -inf  ;;  %v358_v57 = vsel %vm357_vm5, %v352_v49, 0.0 }
 0x2a8   :  { %363 = vmax.xlane.f32.xlu0 %v362_v51 }
 0x331   :  { %v364_v52 = vpop.xlane.xlu0 %363 }
 0x332   :  { %v365_v53 = vsub.f32 %v362_v51, %v364_v52  ;;  %vm373_vm4 = vcmp.eq.f32.partialorder %v362_v51, %v364_v52 }
 0x333   :  { %v374_v0 = vsel %vm373_vm4, %v356_v46, 128 }
 0x334   :  { %v366_v54 = vmul.f32 1.442695, %v365_v53  ;;  %v376_v55 = vshra.s32 %v374_v0, 16  ;;  %v375_v59 = vand.u32 65535, %v374_v0 }
 0x336   :  { %583 = vpow2.f32 %v366_v54  ;;  %v378_v56 = vcvt.s32.f32 %v376_v55  ;;  %v377_v61 = vcvt.s32.f32 %v375_v59 }
 0x338   :  { %379 = vmin.xlane.f32.xlu0 %v378_v56 }
 0x33c   :  { %359 = vadd.xlane.f32.xlu0 %v358_v57 }
 0x343   :  { %v584_v58 = vpop.eup %583 }
 0x344   :  { %368 = vadd.xlane.f32.xlu1 %v584_v58 }
 0x3c1   :  { %v380_v60 = vpop.xlane.xlu0 %379 }
 0x3c2   :  { %vm381_vm6 = vcmp.eq.f32.partialorder %v378_v56, %v380_v60  ;;  %v386_v2 = vcvt.f32.s32 %v380_v60 }
 0x3c3   :  { %v382_v62 = vsel %vm381_vm6, %v377_v61, inf }
 0x3c4   :  { %383 = vmin.xlane.f32.xlu1 %v382_v62  ;;  %v387_v6 = vshll.u32 %v386_v2, 16 }
 0x3c5   :  { %v360_v8 = vpop.xlane.xlu0 %359 }
 0x3c6   :  { %v393_v11 = vsel %vm392_vm7, %v360_v8, 0.0 }
 0x3cd   :  { %v369_v63 = vpop.xlane.xlu1 %368 }
 0x3ce   :  { %585 = vlog2.f32 %v369_v63 }
 0x3db   :  { %v586_v1 = vpop.eup %585 }
 0x3dc   :  { %v371_v3 = vmul.f32 0.6931472, %v586_v1 }
 0x3de   :  { %v372_v9 = vsub.f32 0.0, %v371_v3 }
 0x3e0   :  { %v394_v13 = vsel %vm391_vm8, %v372_v9, %v393_v11 }
 0x44d   :  { %v384_v4 = vpop.xlane.xlu1 %383 }
 0x44e   :  { %v385_v7 = vcvt.f32.s32 %v384_v4 }
 0x450   :  { %v388_v10 = vadd.s32 %v387_v6, %v385_v7 }
 0x452   :  { %v390_v12 = vcvt.s32.f32 %v388_v10 }
 0x454   :  { %v395_v14 = vsel %vm389_vm9, %v390_v12, %v394_v13 }
 0x455   :  { %403 = vst [vmem:[%s726_s3] sm:$0xff] %v395_v14 }
 0x456   :  { %409 = vsyncpa [#allocation3], 1 }

</bundles_post_ra>
